<compile_context>
chip_gen: v5e
topology: v5e:2x2
jax: 0.10.0
libtpu: 0.0.40
codegen_flags: <defaults>
</compile_context>

<pallas_src>
import math
import functools

import jax
import jax.numpy as jnp
from jax import lax
from jax.experimental import pallas as pl
from jax.experimental.pallas import tpu as pltpu


def _round_up(v, m):
    return (v + m - 1) // m * m


# ---------------------------------------------------------------------------
# Kernel body: x_ref, (w_ref, b_ref) * num_layers, o_ref
# ---------------------------------------------------------------------------
def _make_mlp_kernel(num_layers):
    inv_sqrt2 = 1.0 / math.sqrt(2.0)

    def kernel(*refs):
        x_ref = refs[0]
        o_ref = refs[1 + 2 * num_layers]
        h = x_ref[...].astype(jnp.float32)
        for l in range(num_layers):
            w_ref = refs[1 + 2 * l]
            b_ref = refs[2 + 2 * l]
            # Dropout is identity at inference.
            # TODO(synk): training-mode dropout would need in-kernel RNG masking.
            y = jnp.dot(h.astype(w_ref.dtype), w_ref[...],
                        preferred_element_type=jnp.float32)
            y = y + b_ref[...].astype(jnp.float32)      # [1, N] broadcast over [TB, N]
            # Exact GELU (erf), matching nn.GELU() default.
            h = 0.5 * y * (1.0 + lax.erf(y * inv_sqrt2))
        o_ref[...] = h.astype(o_ref.dtype)

    return kernel


# ---------------------------------------------------------------------------
# One-time parameter preparation (hoisted out of the forward path).
# ---------------------------------------------------------------------------
def pad_mlp_params(params, compute_dtype=None):
    """Zero-pad (w, b) to lane-dense (multiple-of-128) shapes ONCE.

    params: list of (w:[K_in, K_out], b:[K_out]) — w is transpose of
            nn.Linear.weight.
    compute_dtype: optionally store weights in bf16 for native-rate MXU
            (loosens accuracy); default keeps the original dtype (f32).
    Padding is exact: padded weight rows/cols and biases are zero, GELU(0)=0,
    so padding columns stay zero through every layer.
    """
    dims = [params[0][0].shape[0]] + [w.shape[1] for (w, _) in params]
    pdims = [_round_up(d, 128) for d in dims]
    padded = []
    for l, (w, b) in enumerate(params):
        dt = compute_dtype or w.dtype
        w_p = (jnp.zeros((pdims[l], pdims[l + 1]), dt)
               .at[: w.shape[0], : w.shape[1]].set(w.astype(dt)))
        b_p = (jnp.zeros((1, pdims[l + 1]), jnp.float32)
               .at[0, : b.shape[0]].set(b.astype(jnp.float32)))
        padded.append((w_p, b_p))
    return padded, tuple(dims), tuple(pdims)


def _vmem_cap_bytes():
    """Physical VMEM of this chip, minus ~15% headroom for compiler scratch."""
    try:
        cap = int(pltpu.get_tpu_info().vmem_capacity_bytes)
    except Exception:
        cap = 128 << 20  # v5e / v6e physical; v7x (64 MiB) clamps via `needed` anyway
    return int(cap * 0.85)


# ---------------------------------------------------------------------------
# Fused forward (eval mode).
# ---------------------------------------------------------------------------
def mlp_layers_forward(x, padded_params, dims, pdims, *, batch_tile=512):
    B, K0 = x.shape
    assert K0 == dims[0], (K0, dims[0])
    num_layers = len(padded_params)

    # Batch tiling: sublane-aligned; keep >= 2 grid steps when the batch allows
    # so the "parallel" axis can shard across v7x's two TensorCores.
    B8 = _round_up(B, 8)
    TB = min(batch_tile, B8)
    if B8 <= TB and B8 >= 16:
        TB = _round_up((B8 + 1) // 2, 8)
    B_pad = _round_up(B8, TB)

    # Per-call padding is only for x (params were padded at setup time).
    if (B_pad, pdims[0]) == (B, K0):
        x_p = x
    else:
        x_p = jnp.zeros((B_pad, pdims[0]), x.dtype).at[:B, :K0].set(x)

    ins = [x_p]
    in_specs = [pl.BlockSpec((TB, pdims[0]), lambda i: (i, 0))]
    wbytes = 0
    for l, (w_p, b_p) in enumerate(padded_params):
        ins += [w_p, b_p]
        # Constant index map -> fetched once; single buffer halves resident VMEM.
        in_specs += [
            pl.BlockSpec((pdims[l], pdims[l + 1]), lambda i: (0, 0),
                         pipeline_mode=pl.Buffered(1)),
            pl.BlockSpec((1, pdims[l + 1]), lambda i: (0, 0),
                         pipeline_mode=pl.Buffered(1)),
        ]
        wbytes += (w_p.size * w_p.dtype.itemsize      # weight tile
                   + 8 * pdims[l + 1] * 4)            # bias row (pads to 8 sublanes)

    # VMEM accounting: double-buffered x/out tiles + resident weights/biases +
    # the largest live f32 intermediates, with ~25% headroom, clamped to the
    # per-chip cap (binding constraint is v7x's 64 MiB).
    io = 2 * TB * pdims[0] * 4 + 2 * TB * pdims[-1] * x.dtype.itemsize
    inter = 2 * TB * max(pdims) * 4
    needed = io + wbytes + inter
    vmem_limit = max(4 << 20, min(int(needed * 1.25), _vmem_cap_bytes()))
    # TODO(synk): fall back to an N/K-tiled multi-pass kernel when the resident
    # weights alone exceed the per-chip VMEM budget (large hidden dims on v7x).

    flops = 2 * B_pad * sum(pdims[l] * pdims[l + 1] for l in range(num_layers))
    transcendentals = B_pad * sum(pdims[1:])
    bytes_accessed = (x_p.size * x_p.dtype.itemsize + wbytes
                      + B_pad * pdims[-1] * x.dtype.itemsize)

    out_p = pl.pallas_call(
        _make_mlp_kernel(num_layers),
        out_shape=jax.ShapeDtypeStruct((B_pad, pdims[-1]), x.dtype),
        grid=(B_pad // TB,),
        in_specs=in_specs,
        out_specs=pl.BlockSpec((TB, pdims[-1]), lambda i: (i, 0)),
        compiler_params=pltpu.CompilerParams(
            dimension_semantics=("parallel",),
            vmem_limit_bytes=vmem_limit,
        ),
        cost_estimate=pl.CostEstimate(
            flops=flops,
            transcendentals=transcendentals,
            bytes_accessed=bytes_accessed,
        ),
    )(*ins)

    # Avoid the post-kernel slice (an extra full HBM copy) when already aligned.
    if B_pad == B and pdims[-1] == dims[-1]:
        return out_p
    return out_p[:B, : dims[-1]]


def init_mlp_params(key, layers):
    """Deterministic xavier_normal_-style weights (stored as [in, out]), zero biases."""
    params = []
    for (fan_in, fan_out) in zip(layers[:-1], layers[1:]):
        key, wk = jax.random.split(key)
        std = math.sqrt(2.0 / (fan_in + fan_out))
        w = jax.random.normal(wk, (fan_in, fan_out), dtype=jnp.float32) * std
        b = jnp.zeros((fan_out,), dtype=jnp.float32)
        params.append((w, b))
    return params


if __name__ == "__main__":
    # Small shapes consistent with the module: layers=[32, 64, 32], batch=8.
    layers = [32, 64, 32]
    batch = 8
    drop_rate = 0.1  # unused at inference (Dropout == identity)

    key = jax.random.PRNGKey(0)
    key, xk = jax.random.split(key)
    x = jax.random.normal(xk, (batch, layers[0]), dtype=jnp.float32)

    params = init_mlp_params(key, layers)

    # One-time padding of the parameters (hoisted out of the forward path).
    padded_params, dims, pdims = pad_mlp_params(params)

    fwd = jax.jit(functools.partial(
        mlp_layers_forward, padded_params=padded_params, dims=dims, pdims=pdims))
    out = fwd(x)
    jax.block_until_ready(out)

    # Sanity-check against a pure-JAX reference (Dropout=id, Linear, exact GELU).
    ref = x
    for (w, b) in params:
        y = ref @ w + b
        ref = 0.5 * y * (1.0 + lax.erf(y / jnp.sqrt(2.0)))

    assert out.shape == (batch, layers[-1]), out.shape
    assert jnp.allclose(out, ref, atol=2e-5, rtol=2e-5), (
        float(jnp.max(jnp.abs(out - ref)))
    )

    print("KERNEL_OK")
</pallas_src>

<mosaic_0001>
module attributes {stable_mosaic.version = 11 : i64} {
  func.func @kernel(%arg0: i32, %arg1: memref<8x128xf32, #tpu.memory_space<vmem>>, %arg2: memref<128x128xf32, #tpu.memory_space<vmem>>, %arg3: memref<1x128xf32, #tpu.memory_space<vmem>>, %arg4: memref<128x128xf32, #tpu.memory_space<vmem>>, %arg5: memref<1x128xf32, #tpu.memory_space<vmem>>, %arg6: memref<8x128xf32, #tpu.memory_space<vmem>>) attributes {dimension_semantics = [#tpu.dimension_semantics<parallel>], iteration_bounds = array<i64: 1>, scalar_prefetch = 0 : i64, scratch_operands = 0 : i64, tpu.core_type = #tpu.core_type<tc>, window_params = [{transform_indices = @transform_0, window_bounds = array<i64: 8, 128>}, {pipeline_mode = #tpu.pipeline_mode<synchronous>, transform_indices = @transform_1, window_bounds = array<i64: 128, 128>}, {pipeline_mode = #tpu.pipeline_mode<synchronous>, transform_indices = @transform_2, window_bounds = array<i64: 1, 128>}, {pipeline_mode = #tpu.pipeline_mode<synchronous>, transform_indices = @transform_3, window_bounds = array<i64: 128, 128>}, {pipeline_mode = #tpu.pipeline_mode<synchronous>, transform_indices = @transform_4, window_bounds = array<i64: 1, 128>}, {transform_indices = @transform_5, window_bounds = array<i64: 8, 128>}]} {
    %c0 = arith.constant 0 : index
    %c0_0 = arith.constant 0 : index
    %0 = vector.load %arg1[%c0, %c0_0] : memref<8x128xf32, #tpu.memory_space<vmem>>, vector<8x128xf32>
    %c0_1 = arith.constant 0 : index
    %c0_2 = arith.constant 0 : index
    %1 = vector.load %arg2[%c0_1, %c0_2] : memref<128x128xf32, #tpu.memory_space<vmem>>, vector<128x128xf32>
    %cst = arith.constant dense<0.000000e+00> : vector<8x128xf32>
    %2 = tpu.matmul %0, %1, %cst {dimension_numbers = #tpu.dot_dimension_numbers<[1], [0], [0], [1], [0, 0, 1, 1], [], []>} : vector<8x128xf32>, vector<128x128xf32>, vector<8x128xf32> -> vector<8x128xf32>
    %c0_3 = arith.constant 0 : index
    %c0_4 = arith.constant 0 : index
    %3 = vector.load %arg3[%c0_3, %c0_4] : memref<1x128xf32, #tpu.memory_space<vmem>>, vector<1x128xf32>
    %4 = vector.broadcast %3 : vector<1x128xf32> to vector<8x128xf32>
    %5 = arith.addf %2, %4 : vector<8x128xf32>
    %cst_5 = arith.constant 5.000000e-01 : f32
    %6 = vector.broadcast %cst_5 : f32 to vector<8x128xf32>
    %7 = arith.mulf %6, %5 : vector<8x128xf32>
    %cst_6 = arith.constant 0.707106769 : f32
    %8 = vector.broadcast %cst_6 : f32 to vector<8x128xf32>
    %9 = arith.mulf %5, %8 : vector<8x128xf32>
    %10 = math.erf %9 : vector<8x128xf32>
    %cst_7 = arith.constant 1.000000e+00 : f32
    %11 = vector.broadcast %cst_7 : f32 to vector<8x128xf32>
    %12 = arith.addf %11, %10 : vector<8x128xf32>
    %13 = arith.mulf %7, %12 : vector<8x128xf32>
    %c0_8 = arith.constant 0 : index
    %c0_9 = arith.constant 0 : index
    %14 = vector.load %arg4[%c0_8, %c0_9] : memref<128x128xf32, #tpu.memory_space<vmem>>, vector<128x128xf32>
    %cst_10 = arith.constant dense<0.000000e+00> : vector<8x128xf32>
    %15 = tpu.matmul %13, %14, %cst_10 {dimension_numbers = #tpu.dot_dimension_numbers<[1], [0], [0], [1], [0, 0, 1, 1], [], []>} : vector<8x128xf32>, vector<128x128xf32>, vector<8x128xf32> -> vector<8x128xf32>
    %c0_11 = arith.constant 0 : index
    %c0_12 = arith.constant 0 : index
    %16 = vector.load %arg5[%c0_11, %c0_12] : memref<1x128xf32, #tpu.memory_space<vmem>>, vector<1x128xf32>
    %17 = vector.broadcast %16 : vector<1x128xf32> to vector<8x128xf32>
    %18 = arith.addf %15, %17 : vector<8x128xf32>
    %cst_13 = arith.constant 5.000000e-01 : f32
    %19 = vector.broadcast %cst_13 : f32 to vector<8x128xf32>
    %20 = arith.mulf %19, %18 : vector<8x128xf32>
    %cst_14 = arith.constant 0.707106769 : f32
    %21 = vector.broadcast %cst_14 : f32 to vector<8x128xf32>
    %22 = arith.mulf %18, %21 : vector<8x128xf32>
    %23 = math.erf %22 : vector<8x128xf32>
    %cst_15 = arith.constant 1.000000e+00 : f32
    %24 = vector.broadcast %cst_15 : f32 to vector<8x128xf32>
    %25 = arith.addf %24, %23 : vector<8x128xf32>
    %26 = arith.mulf %20, %25 : vector<8x128xf32>
    %c0_16 = arith.constant 0 : index
    %c0_17 = arith.constant 0 : index
    %27 = vector.load %arg6[%c0_16, %c0_17] : memref<8x128xf32, #tpu.memory_space<vmem>>, vector<8x128xf32>
    tpu.vector_store %arg6[%c0_16, %c0_17], %26 {strides = array<i32>} : memref<8x128xf32, #tpu.memory_space<vmem>>, vector<8x128xf32>,
    return
  }
  func.func @transform_0(%arg0: i32) -> (i32, i32) {
    %c0_i32 = arith.constant 0 : i32
    %c0_i32_0 = arith.constant 0 : i32
    return %arg0, %c0_i32 : i32, i32
  }
  func.func @transform_1(%arg0: i32) -> (i32, i32) {
    %c0_i32 = arith.constant 0 : i32
    %c0_i32_0 = arith.constant 0 : i32
    %c0_i32_1 = arith.constant 0 : i32
    return %c0_i32, %c0_i32_0 : i32, i32
  }
  func.func @transform_2(%arg0: i32) -> (i32, i32) {
    %c0_i32 = arith.constant 0 : i32
    %c0_i32_0 = arith.constant 0 : i32
    %c0_i32_1 = arith.constant 0 : i32
    return %c0_i32, %c0_i32_0 : i32, i32
  }
  func.func @transform_3(%arg0: i32) -> (i32, i32) {
    %c0_i32 = arith.constant 0 : i32
    %c0_i32_0 = arith.constant 0 : i32
    %c0_i32_1 = arith.constant 0 : i32
    return %c0_i32, %c0_i32_0 : i32, i32
  }
  func.func @transform_4(%arg0: i32) -> (i32, i32) {
    %c0_i32 = arith.constant 0 : i32
    %c0_i32_0 = arith.constant 0 : i32
    %c0_i32_1 = arith.constant 0 : i32
    return %c0_i32, %c0_i32_0 : i32, i32
  }
  func.func @transform_5(%arg0: i32) -> (i32, i32) {
    %c0_i32 = arith.constant 0 : i32
    %c0_i32_0 = arith.constant 0 : i32
    return %arg0, %c0_i32 : i32, i32
  }
}

</mosaic_0001>

<bundles_post_ra>
// kernel: mlp_layers_forward.1
= control target key start
LH: loop header
LB: loop body
LE: loop exit
PB: predicated region body
PF: predicated region fallthrough
CT: control target
= control target key end

     0   :  { %10 = vsyncpa [#allocation3], 0  ;;  %s385_s0 = inlined_call_operand.vmem [shape: f32[8,128], index: 0, kind: input, shape index: {}]   ;;  %s386_s1 = inlined_call_operand.hbm [shape: f32[128,128], index: 1, kind: input, shape index: {}]   ;;  %s387_s2 = inlined_call_operand.vmem [shape: f32[1,128], index: 2, kind: input, shape index: {}, may-alias: {2,4}]   ;;  %s388_s3 = inlined_call_operand.hbm [shape: f32[128,128], index: 3, kind: input, shape index: {}]   ;;  %s389_s4 = inlined_call_operand.vmem [shape: f32[1,128], index: 4, kind: input, shape index: {}, may-alias: {2,4}]   ;;  %s390_s5 = inlined_call_operand.hbm [shape: f32[8,128], index: 5, kind: output, shape index: {}]  }
   0x1   :  { %11 = vsyncpa [#allocation6], 0 }
   0x2   :  { %12 = vsyncpa [#allocation4], 0  ;;  %s19_s20 = sshll.u32 %s386_s1, 4  ;;  %s332_s21 = smov [#allocation2]   ;;  %s20_s20 = int_to_ptr.hbm [resolvable:$true] %s19_s20 }
   0x3   :  { %s21_s22 = sshll.u32 %s332_s21, 4  ;;  %s34_s25 = sshll.u32 %s388_s3, 4  ;;  %s22_s22 = int_to_ptr.vmem [resolvable:$true] %s21_s22  ;;  %s35_s25 = int_to_ptr.hbm [resolvable:$true] %s34_s25 }
   0x4   :  { %s333_s26 = smov 128   ;;  %s334_s27 = smov 8  }
   0x5   :  { %27 = dma.hbm_to_vmem [thread:$0]  %s20_s20, 2048, %s22_s22, [#allocation3], %s333_s26, %s333_s26, %s334_s27  }
   0x6   :  { %s335_s28 = smov [#allocation5]  }
   0x7   :  { %s36_s29 = sshll.u32 %s335_s28, 4  ;;  %s37_s29 = int_to_ptr.vmem [resolvable:$true] %s36_s29 }
   0x8   :  { %42 = dma.hbm_to_vmem [thread:$0]  %s35_s25, 2048, %s37_s29, [#allocation6], %s333_s26, %s333_s26, %s334_s27  }
   0x9   :  { %326 = dma.done.wait [#allocation3], 2048  }
   0xa   :  { %327 = vsyncadd [#allocation3], 4294965248 }
   0xb   :  { %328 = dma.done.wait [#allocation6], 2048  }
   0xc   :  { %329 = vsyncadd [#allocation6], 4294965248  ;;  %v69_v0 = vld [vmem:[#allocation2 + $0x78] sm:$0xff]  ;;  %v68_v1 = vld [vmem:[#allocation2 + $0x70] sm:$0xff]  ;;  %s230_s10 = sshll.u32 %s390_s5, 4  ;;  %s231_s10 = int_to_ptr.hbm [resolvable:$true] %s230_s10 }
   0xd   :  { %74 = vmatpush.msra.mxu0 %v69_v0  ;;  %v67_v2 = vld [vmem:[#allocation2 + $0x68] sm:$0xff]  ;;  %v66_v3 = vld [vmem:[#allocation2 + $0x60] sm:$0xff]  ;;  %v65_v4 = vld [vmem:[#allocation2 + $0x58] sm:$0xff] }
   0xe   :  { %v64_v5 = vld [vmem:[#allocation2 + $0x50] sm:$0xff]  ;;  %v63_v6 = vld [vmem:[#allocation2 + $0x48] sm:$0xff]  ;;  %v62_v7 = vld [vmem:[#allocation2 + $0x40] sm:$0xff] }
   0xf   :  { %75 = vmatpush.msra.mxu0 %v68_v1  ;;  %v61_v8 = vld [vmem:[#allocation2 + $0x38] sm:$0xff]  ;;  %v60_v9 = vld [vmem:[#allocation2 + $0x30] sm:$0xff]  ;;  %v59_v10 = vld [vmem:[#allocation2 + $0x28] sm:$0xff] }
  0x10   :  { %v58_v11 = vld [vmem:[#allocation2 + $0x20] sm:$0xff]  ;;  %v57_v12 = vld [vmem:[#allocation2 + $0x18] sm:$0xff]  ;;  %v56_v13 = vld [vmem:[#allocation2 + $0x10] sm:$0xff] }
  0x11   :  { %76 = vmatpush.msra.mxu0 %v67_v2  ;;  %v55_v14 = vld [vmem:[#allocation2 + $0x8] sm:$0xff]  ;;  %v54_v15 = vld [vmem:[#allocation2] sm:$0xff]  ;;  %v153_v17 = vld [vmem:[#allocation5 + $0x78] sm:$0xff] }
  0x12   :  { %v53_v16 = vld [vmem:[%s385_s0] sm:$0xff]  ;;  %158 = vmatpush.msra.mxu1 %v153_v17  ;;  %v152_v18 = vld [vmem:[#allocation5 + $0x70] sm:$0xff]  ;;  %v151_v19 = vld [vmem:[#allocation5 + $0x68] sm:$0xff] }
  0x13   :  { %77 = vmatpush.msra.mxu0 %v66_v3  ;;  %v150_v20 = vld [vmem:[#allocation5 + $0x60] sm:$0xff]  ;;  %v149_v22 = vld [vmem:[#allocation5 + $0x58] sm:$0xff]  ;;  %v148_v23 = vld [vmem:[#allocation5 + $0x50] sm:$0xff] }
  0x14   :  { %159 = vmatpush.msra.mxu1 %v152_v18  ;;  %v248_v21 = vld [vmem:[%s387_s2] ss:$0 sm:$0xff]  ;;  %v147_v25 = vld [vmem:[#allocation5 + $0x48] sm:$0xff]  ;;  %v145_v29 = vld [vmem:[#allocation5 + $0x38] sm:$0xff] }
  0x15   :  { %78 = vmatpush.msra.mxu0 %v65_v4  ;;  %v146_v27 = vld [vmem:[#allocation5 + $0x40] sm:$0xff]  ;;  %v144_v31 = vld [vmem:[#allocation5 + $0x30] sm:$0xff]  ;;  %v143_v33 = vld [vmem:[#allocation5 + $0x28] sm:$0xff] }
  0x16   :  { %160 = vmatpush.msra.mxu1 %v151_v19  ;;  %v142_v36 = vld [vmem:[#allocation5 + $0x20] sm:$0xff]  ;;  %v141_v39 = vld [vmem:[#allocation5 + $0x18] sm:$0xff]  ;;  %v140_v42 = vld [vmem:[#allocation5 + $0x10] sm:$0xff] }
  0x17   :  { %79 = vmatpush.msra.mxu0 %v64_v5  ;;  %v139_v45 = vld [vmem:[#allocation5 + $0x8] sm:$0xff]  ;;  %v138_v47 = vld [vmem:[#allocation5] sm:$0xff] }
  0x18   :  { %161 = vmatpush.msra.mxu1 %v150_v20 }
  0x19   :  { %80 = vmatpush.msra.mxu0 %v63_v6 }
  0x1a   :  { %162 = vmatpush.msra.mxu1 %v149_v22 }
  0x1b   :  { %81 = vmatpush.msra.mxu0 %v62_v7 }
  0x1c   :  { %163 = vmatpush.msra.mxu1 %v148_v23 }
  0x1d   :  { %82 = vmatpush.msra.mxu0 %v61_v8 }
  0x1e   :  { %164 = vmatpush.msra.mxu1 %v147_v25 }
  0x1f   :  { %83 = vmatpush.msra.mxu0 %v60_v9 }
  0x20   :  { %165 = vmatpush.msra.mxu1 %v146_v27 }
  0x21   :  { %84 = vmatpush.msra.mxu0 %v59_v10 }
  0x22   :  { %166 = vmatpush.msra.mxu1 %v145_v29 }
  0x23   :  { %85 = vmatpush.msra.mxu0 %v58_v11  ;;  %v249_v11 = vld [vmem:[%s389_s4] ss:$0 sm:$0xff]  ;;  %s336_s4 = smov [#allocation7]  }
  0x24   :  { %167 = vmatpush.msra.mxu1 %v144_v31  ;;  %s228_s7 = sshll.u32 %s336_s4, 4  ;;  %s229_s7 = int_to_ptr.vmem [resolvable:$true] %s228_s7 }
  0x25   :  { %86 = vmatpush.msra.mxu0 %v57_v12 }
  0x26   :  { %168 = vmatpush.msra.mxu1 %v143_v33 }
  0x27   :  { %87 = vmatpush.msra.mxu0 %v56_v13 }
  0x28   :  { %169 = vmatpush.msra.mxu1 %v142_v36 }
  0x29   :  { %88 = vmatpush.msra.mxu0 %v55_v14 }
  0x2a   :  { %170 = vmatpush.msra.mxu1 %v141_v39 }
  0x2b   :  { %89 = vmatpush.msra.mxu0 %v54_v15 }
  0x2c   :  { %90 = vmatmul.f32.vlgmr.msra.gmra.mxu0 %v53_v16  ;;  %171 = vmatpush.msra.mxu1 %v140_v42 }
  0x2e   :  { %172 = vmatpush.msra.mxu1 %v139_v45 }
  0x30   :  { %173 = vmatpush.msra.mxu1 %v138_v47 }
  0xa9   :  { %v91_v24 = vpop.f32.mrf.mxu0 }
  0xaa   :  { %v92_v26 = vadd.f32 %v248_v21, %v91_v24 }
  0xac   :  { %v95_v28 = vmul.f32 0.70710677, %v92_v26  ;;  %v94_v8 = vmul.f32 0.5, %v92_v26 }
  0xae   :  { %v96_v30 = vmul.f32 %v95_v28, %v95_v28 }
  0xb0   :  { %v97_v32 = vmin.f32 %v96_v30, 16.0 }
  0xb2   :  { %v98_v34 = vmul.f32 2.1237322e-06, %v97_v32  ;;  %v109_v35 = vmul.f32 3.8918573e-05, %v97_v32 }
  0xb4   :  { %v99_v37 = vadd.f32 0.00028619796, %v98_v34  ;;  %v110_v38 = vadd.f32 0.001143296, %v109_v35 }
  0xb6   :  { %v100_v40 = vmul.f32 %v99_v37, %v97_v32  ;;  %v111_v41 = vmul.f32 %v110_v38, %v97_v32 }
  0xb8   :  { %v112_v43 = vadd.f32 0.014752088, %v111_v41  ;;  %v101_v44 = vadd.f32 0.0036580483, %v100_v40 }
  0xba   :  { %v113_v46 = vmul.f32 %v112_v43, %v97_v32  ;;  %v102_v49 = vmul.f32 %v101_v44, %v97_v32 }
  0xbc   :  { %v114_v48 = vadd.f32 0.112945676, %v113_v46  ;;  %v103_v52 = vadd.f32 0.05243302, %v102_v49 }
  0xbe   :  { %v115_v50 = vmul.f32 %v114_v48, %v97_v32  ;;  %v104_v55 = vmul.f32 %v103_v52, %v97_v32 }
  0xc0   :  { %v116_v51 = vadd.f32 0.4994258, %v115_v50  ;;  %v105_v56 = vadd.f32 0.18741608, %v104_v55 }
  0xc2   :  { %v117_v53 = vmul.f32 %v116_v51, %v97_v32  ;;  %v106_v58 = vmul.f32 %v105_v56, %v97_v32 }
  0xc4   :  { %v118_v54 = vadd.f32 1.0, %v117_v53  ;;  %v107_v62 = vadd.f32 1.1283791, %v106_v58 }
  0xc6   :  { %250 = vrcp.f32 %v118_v54  ;;  %v130_v61 = vand.u32 2147483648, %v118_v54  ;;  %v128_v0 = vand.u32 2147483647, %v118_v54  ;;  %vm124_vm1 = vweird.f32 %v118_v54 }
  0xc7   :  { %v108_v3 = vmul.f32 %v107_v62, %v95_v28 }
  0xc8   :  { %v131_v2 = vor.u32 1.1754944e-38, %v130_v61  ;;  %vm129_vm3 = vcmp.eq.f32.partialorder %v128_v0, 8.507059e+37 }
  0xcc   :  { %v251_v57 = vpop.eup %250 }
  0xcd   :  { %v120_v59 = vmul.f32 %v251_v57, %v118_v54  ;;  %vm125_vm0 = vweird.f32 %v251_v57 }
  0xce   :  { %vm126_vm2 = vmor %vm124_vm1, %vm125_vm0 }
  0xcf   :  { %v121_v60 = vsub.f32 1.0, %v120_v59 }
  0xd1   :  { %v122_v63 = vmul.f32 %v251_v57, %v121_v60 }
  0xd3   :  { %v123_v1 = vadd.f32 %v251_v57, %v122_v63 }
  0xd5   :  { %v127_v4 = vsel %vm126_vm2, %v251_v57, %v123_v1 }
  0xd6   :  { %v132_v5 = vsel %vm129_vm3, %v131_v2, %v127_v4 }
  0xd7   :  { %v133_v6 = vmul.f32 %v132_v5, %v108_v3 }
  0xd9   :  { %v241_v7 = vclamps-f32 %v133_v6, 1.0 }
  0xdb   :  { %v136_v9 = vadd.f32 1.0, %v241_v7 }
  0xdd   :  { %v137_v10 = vmul.f32 %v136_v9, %v94_v8 }
  0xdf   :  { %174 = vmatmul.f32.vlgmr.msra.gmra.mxu1 %v137_v10 }
 0x15c   :  { %v175_v12 = vpop.f32.mrf.mxu1 }
 0x15d   :  { %v176_v13 = vadd.f32 %v249_v11, %v175_v12 }
 0x15f   :  { %v179_v14 = vmul.f32 0.70710677, %v176_v13  ;;  %v178_v50 = vmul.f32 0.5, %v176_v13 }
 0x161   :  { %v180_v15 = vmul.f32 %v179_v14, %v179_v14 }
 0x163   :  { %v181_v16 = vmin.f32 %v180_v15, 16.0 }
 0x165   :  { %v182_v17 = vmul.f32 2.1237322e-06, %v181_v16  ;;  %v193_v18 = vmul.f32 3.8918573e-05, %v181_v16 }
 0x167   :  { %v183_v19 = vadd.f32 0.00028619796, %v182_v17  ;;  %v194_v20 = vadd.f32 0.001143296, %v193_v18 }
 0x169   :  { %v184_v21 = vmul.f32 %v183_v19, %v181_v16  ;;  %v195_v22 = vmul.f32 %v194_v20, %v181_v16 }
 0x16b   :  { %v196_v23 = vadd.f32 0.014752088, %v195_v22  ;;  %v185_v24 = vadd.f32 0.0036580483, %v184_v21 }
 0x16d   :  { %v197_v25 = vmul.f32 %v196_v23, %v181_v16  ;;  %v186_v27 = vmul.f32 %v185_v24, %v181_v16 }
 0x16f   :  { %v198_v26 = vadd.f32 0.112945676, %v197_v25  ;;  %v187_v30 = vadd.f32 0.05243302, %v186_v27 }
 0x171   :  { %v199_v28 = vmul.f32 %v198_v26, %v181_v16  ;;  %v188_v33 = vmul.f32 %v187_v30, %v181_v16 }
 0x173   :  { %v200_v29 = vadd.f32 0.4994258, %v199_v28  ;;  %v189_v34 = vadd.f32 0.18741608, %v188_v33 }
 0x175   :  { %v201_v31 = vmul.f32 %v200_v29, %v181_v16  ;;  %v190_v36 = vmul.f32 %v189_v34, %v181_v16 }
 0x177   :  { %v202_v32 = vadd.f32 1.0, %v201_v31  ;;  %v191_v40 = vadd.f32 1.1283791, %v190_v36 }
 0x179   :  { %252 = vrcp.f32 %v202_v32  ;;  %v214_v39 = vand.u32 2147483648, %v202_v32  ;;  %v212_v42 = vand.u32 2147483647, %v202_v32  ;;  %vm208_vm5 = vweird.f32 %v202_v32 }
 0x17a   :  { %v192_v45 = vmul.f32 %v191_v40, %v179_v14 }
 0x17b   :  { %v215_v44 = vor.u32 1.1754944e-38, %v214_v39  ;;  %vm213_vm7 = vcmp.eq.f32.partialorder %v212_v42, 8.507059e+37 }
 0x17f   :  { %v253_v35 = vpop.eup %252 }
 0x180   :  { %v204_v37 = vmul.f32 %v253_v35, %v202_v32  ;;  %vm209_vm4 = vweird.f32 %v253_v35 }
 0x181   :  { %vm210_vm6 = vmor %vm208_vm5, %vm209_vm4 }
 0x182   :  { %v205_v38 = vsub.f32 1.0, %v204_v37 }
 0x184   :  { %v206_v41 = vmul.f32 %v253_v35, %v205_v38 }
 0x186   :  { %v207_v43 = vadd.f32 %v253_v35, %v206_v41 }
 0x188   :  { %v211_v46 = vsel %vm210_vm6, %v253_v35, %v207_v43 }
 0x189   :  { %v216_v47 = vsel %vm213_vm7, %v215_v44, %v211_v46 }
 0x18a   :  { %v217_v48 = vmul.f32 %v216_v47, %v192_v45 }
 0x18c   :  { %v242_v49 = vclamps-f32 %v217_v48, 1.0 }
 0x18e   :  { %v220_v51 = vadd.f32 1.0, %v242_v49 }
 0x190   :  { %v221_v52 = vmul.f32 %v220_v51, %v178_v50 }
 0x192   :  { %222 = vst [vmem:[#allocation7] sm:$0xff] %v221_v52 }
 0x193   :  { %233 = dma.vmem_to_hbm [thread:$0]  %s229_s7, 128, %s231_s10, [#allocation4]  }
 0x194   :  { %330 = dma.done.wait [#allocation4], 128  }
 0x195   :  { %331 = vsyncadd [#allocation4], 4294967168 }
 0x196   :  { %238 = vsyncpa [#allocation3], 1 }
 0x197   :  { %239 = vsyncpa [#allocation6], 1 }
 0x198   :  { %240 = vsyncpa [#allocation4], 1 }

</bundles_post_ra>
